<compile_context>
chip_gen: v7x
topology: tpu7x:2x2x1
jax: 0.10.0
libtpu: 0.0.40
codegen_flags: <defaults>
</compile_context>

<pallas_src>
import functools
import jax
import jax.numpy as jnp
from jax.experimental import pallas as pl
from jax.experimental.pallas import tpu as pltpu

HID = 32          # hid_dim
N_HEADS = 4       # n_heads
HEAD_DIM = HID // N_HEADS
PF = 64           # pf_dim
EPS = 1e-5        # nn.LayerNorm default eps


def _layernorm(x, g, b):
    mu = jnp.mean(x, axis=-1, keepdims=True)
    var = jnp.mean((x - mu) ** 2, axis=-1, keepdims=True)
    return (x - mu) * jax.lax.rsqrt(var + EPS) * g + b


def encoder_layer_kernel(src_ref, mask_ref, wqkvo_ref, w1_ref, w2_ref,
                         bias_ref, out_ref, *, bb, seq):
    # Activations: whole row-tile, flattened (bb*S, H) f32.
    x = src_ref[...]                                     # (bb*S, H) f32
    xb = x.astype(jnp.bfloat16)

    # Fused weight slab: [Wq*inv_scale | Wk | Wv | Wo]  -> (H, 4H) bf16.
    w = wqkvo_ref[...]                                   # (32, 128) bf16
    w_qkv = w[:, 0:3 * HID]                              # (32, 96)
    w_o = w[:, 3 * HID:4 * HID]                          # (32, 32)

    # Bias / LayerNorm slab: (3, 128) f32.
    bias = bias_ref[...]
    b_qkv = bias[0:1, 0:3 * HID]                         # (1, 96)
    b_o = bias[0:1, 3 * HID:4 * HID]                     # (1, 32)
    b_1 = bias[1:2, 0:PF]                                # (1, 64)
    b_2 = bias[1:2, PF:PF + HID]                         # (1, 32)
    ln1_g = bias[1:2, PF + HID:PF + 2 * HID]             # (1, 32)
    ln1_b = bias[2:3, 0:HID]                             # (1, 32)
    ln2_g = bias[2:3, HID:2 * HID]                       # (1, 32)
    ln2_b = bias[2:3, 2 * HID:3 * HID]                   # (1, 32)

    # ---- fused QKV projection (1 MXU push instead of 12) ----
    qkv = jnp.dot(xb, w_qkv, preferred_element_type=jnp.float32) + b_qkv  # (bb*S, 96)

    n = N_HEADS * bb

    def heads_of(col_base):
        # (bb*S, 96) column block -> (N_HEADS*bb, S, hd), head-major leading dim.
        parts = []
        for h in range(N_HEADS):
            c0 = col_base + h * HEAD_DIM
            parts.append(qkv[:, c0:c0 + HEAD_DIM].reshape(1, bb, seq, HEAD_DIM))
        stacked = jnp.concatenate(parts, axis=0)          # (NH, bb, S, hd)
        return stacked.reshape(n, seq, HEAD_DIM)

    q = heads_of(0).astype(jnp.bfloat16)                  # scale already folded in
    k = heads_of(HID).astype(jnp.bfloat16)
    v = heads_of(2 * HID).astype(jnp.bfloat16)

    # ---- additive mask bias, materialized ONCE at full (n, S, S) ----
    m = mask_ref[...]                                     # (bb, 1, S)
    neg = jnp.where(m == 0.0, -1e10, 0.0)                 # (bb, 1, S)
    neg = jnp.broadcast_to(neg[None, :, :, :], (N_HEADS, bb, seq, seq))
    neg = neg.reshape(n, seq, seq)

    # ---- single batched attention over all (head, batch) pairs ----
    energy = jnp.einsum('nqd,nkd->nqk', q, k,
                        preferred_element_type=jnp.float32) + neg   # (n, S, S)
    e_max = jnp.max(energy, axis=-1, keepdims=True)
    p = jnp.exp(energy - e_max)
    denom = jnp.sum(p, axis=-1, keepdims=True)
    attn = p * pl.reciprocal(denom, approx=True)          # divide on EUP

    ctx = jnp.einsum('nqk,nkd->nqd', attn.astype(jnp.bfloat16), v,
                     preferred_element_type=jnp.float32)  # (n, S, hd)

    # ---- re-assemble heads in PyTorch concat order, single output proj ----
    ctx = ctx.reshape(N_HEADS, bb * seq, HEAD_DIM)
    ctx_slab = jnp.concatenate([ctx[h] for h in range(N_HEADS)], axis=-1)  # (bb*S, H)

    attn_out = jnp.dot(ctx_slab.astype(jnp.bfloat16), w_o,
                       preferred_element_type=jnp.float32) + b_o

    # ---- residual + layernorm (f32) ----
    src1 = _layernorm(x + attn_out, ln1_g, ln1_b)

    # ---- positionwise feedforward (bf16 matmuls, f32 accumulate) ----
    hidden = jnp.maximum(
        jnp.dot(src1.astype(jnp.bfloat16), w1_ref[...],
                preferred_element_type=jnp.float32) + b_1, 0.0)
    ffn = jnp.dot(hidden.astype(jnp.bfloat16), w2_ref[...],
                  preferred_element_type=jnp.float32) + b_2

    # ---- residual + layernorm (f32) ----
    out_ref[...] = _layernorm(src1 + ffn, ln2_g, ln2_b).astype(out_ref.dtype)


def encoder_layer(src, mask, params, *, batch_block=None):
    (wq, bq, wk, bk, wv, bv, wo, bo,
     ln1_g, ln1_b, w1, b1, w2, b2, ln2_g, ln2_b) = params
    B, S, H = src.shape
    assert H == HID
    if batch_block is None:
        # Single-TC chips (v5e/v6e): one grid step is best.  On v7x with a
        # real batch, pass batch_block=B//2 so the "parallel" axis shards
        # across the two TensorCores (and stays inside the 64 MiB VMEM).
        batch_block = B
    assert B % batch_block == 0
    bb = batch_block
    n_steps = B // bb

    inv_scale = 1.0 / (float(HEAD_DIM) ** 0.5)

    # ---- wrapper-side layout plumbing (free, runs once under XLA) ----
    # Fused [Wq/scale | Wk | Wv | Wo] weight slab, bf16 for the MXU.
    w_qkvo = jnp.concatenate([wq * inv_scale, wk, wv, wo],
                             axis=1).astype(jnp.bfloat16)            # (32, 128)
    w1_b = w1.astype(jnp.bfloat16)                                   # (32, 64)
    w2_b = w2.astype(jnp.bfloat16)                                   # (64, 32)

    # All row-vector params packed into one (3, 128) f32 slab.
    row0 = jnp.concatenate([bq * inv_scale, bk, bv, bo], axis=1)     # (1, 128)
    row1 = jnp.concatenate([b1, b2, ln1_g], axis=1)                  # (1, 128)
    row2 = jnp.concatenate([ln1_b, ln2_g, ln2_b,
                            jnp.zeros((1, HID), jnp.float32)], axis=1)
    bias_slab = jnp.concatenate([row0, row1, row2], axis=0)          # (3, 128)

    # Lane/sublane-dense activation slab.
    src2 = src.reshape(B * S, H)

    kernel = functools.partial(encoder_layer_kernel, bb=bb, seq=S)
    out_shape = jax.ShapeDtypeStruct((B * S, H), jnp.float32)
    args = (src2, mask, w_qkvo, w1_b, w2_b, bias_slab)

    if n_steps == 1:
        # No grid / no pipelining machinery: whole arrays live in VMEM.
        vmem_spec = pl.BlockSpec(memory_space=pltpu.MemorySpace.VMEM)
        out = pl.pallas_call(
            kernel,
            out_shape=out_shape,
            in_specs=[vmem_spec] * len(args),
            out_specs=vmem_spec,
        )(*args)
    else:
        def const_spec(shape):
            nd = len(shape)
            return pl.BlockSpec(shape, lambda i, nd=nd: (0,) * nd)

        in_specs = [
            pl.BlockSpec((bb * S, H), lambda i: (i, 0)),      # activations
            pl.BlockSpec((bb, 1, S), lambda i: (i, 0, 0)),    # mask
            const_spec(w_qkvo.shape),
            const_spec(w1_b.shape),
            const_spec(w2_b.shape),
            const_spec(bias_slab.shape),
        ]
        out = pl.pallas_call(
            kernel,
            out_shape=out_shape,
            grid=(n_steps,),
            in_specs=in_specs,
            out_specs=pl.BlockSpec((bb * S, H), lambda i: (i, 0)),
            compiler_params=pltpu.CompilerParams(
                dimension_semantics=("parallel",)),
        )(*args)
    return out.reshape(B, S, H)


# ---------------- pure-JAX reference (for correctness check) ----------------
def encoder_layer_ref(src, mask, params):
    (wq, bq, wk, bk, wv, bv, wo, bo,
     ln1_g, ln1_b, w1, b1, w2, b2, ln2_g, ln2_b) = params
    B, S, H = src.shape
    Q = src @ wq + bq
    K = src @ wk + bk
    V = src @ wv + bv
    qh = Q.reshape(B, S, N_HEADS, HEAD_DIM).transpose(0, 2, 1, 3)
    kh = K.reshape(B, S, N_HEADS, HEAD_DIM).transpose(0, 2, 1, 3)
    vh = V.reshape(B, S, N_HEADS, HEAD_DIM).transpose(0, 2, 1, 3)
    energy = jnp.einsum("bhqd,bhkd->bhqk", qh, kh) / (float(HEAD_DIM) ** 0.5)
    m = mask[:, None, :, :]                         # (B,1,1,S)
    energy = jnp.where(m == 0.0, -1e10, energy)
    attn = jax.nn.softmax(energy, axis=-1)
    ctx = jnp.einsum("bhqk,bhkd->bhqd", attn, vh)
    ctx = ctx.transpose(0, 2, 1, 3).reshape(B, S, H)
    attn_out = ctx @ wo + bo
    src1 = _layernorm(src + attn_out, ln1_g, ln1_b)
    ffn = jnp.maximum(src1 @ w1 + b1, 0.0) @ w2 + b2
    return _layernorm(src1 + ffn, ln2_g, ln2_b)


def make_params(key):
    ks = jax.random.split(key, 8)
    s = 0.02
    wq = s * jax.random.normal(ks[0], (HID, HID), jnp.float32)
    wk = s * jax.random.normal(ks[1], (HID, HID), jnp.float32)
    wv = s * jax.random.normal(ks[2], (HID, HID), jnp.float32)
    wo = s * jax.random.normal(ks[3], (HID, HID), jnp.float32)
    w1 = s * jax.random.normal(ks[4], (HID, PF), jnp.float32)
    w2 = s * jax.random.normal(ks[5], (PF, HID), jnp.float32)
    bq = jnp.zeros((1, HID), jnp.float32)
    bk = jnp.zeros((1, HID), jnp.float32)
    bv = jnp.zeros((1, HID), jnp.float32)
    bo = jnp.zeros((1, HID), jnp.float32)
    b1 = jnp.zeros((1, PF), jnp.float32)
    b2 = jnp.zeros((1, HID), jnp.float32)
    ln1_g = jnp.ones((1, HID), jnp.float32)
    ln1_b = jnp.zeros((1, HID), jnp.float32)
    ln2_g = jnp.ones((1, HID), jnp.float32)
    ln2_b = jnp.zeros((1, HID), jnp.float32)
    return (wq, bq, wk, bk, wv, bv, wo, bo,
            ln1_g, ln1_b, w1, b1, w2, b2, ln2_g, ln2_b)


if __name__ == "__main__":
    # TODO(synk): dropout is identity (eval mode); attention weights (second
    # return value of MultiHeadAttentionLayer) are not returned by EncoderLayer.
    B, S = 2, 8
    key = jax.random.PRNGKey(0)
    k_src, k_par = jax.random.split(key)
    src = jax.random.normal(k_src, (B, S, HID), jnp.float32)
    # mask out the last 2 key positions for batch element 1
    mask = jnp.ones((B, 1, S), jnp.float32)
    mask = mask.at[1, 0, -2:].set(0.0)
    params = make_params(k_par)

    out = encoder_layer(src, mask, params)
    out = jax.block_until_ready(out)

    ref = encoder_layer_ref(src, mask, params)
    assert out.shape == (B, S, HID)
    # bf16 MXU operands (f32 accumulation, f32 residual/softmax/LayerNorm):
    # tolerance loosened accordingly vs. the pure-f32 reference.
    assert jnp.allclose(out, ref, rtol=1e-2, atol=1e-2), "mismatch vs reference"
    print("KERNEL_OK")
</pallas_src>

<mosaic_0001>
module attributes {stable_mosaic.version = 11 : i64} {
  func.func @encoder_layer_kernel(%arg0: memref<16x32xf32, #tpu.memory_space<vmem>>, %arg1: memref<2x1x8xf32, #tpu.memory_space<vmem>>, %arg2: memref<32x128xbf16, #tpu.memory_space<vmem>>, %arg3: memref<32x64xbf16, #tpu.memory_space<vmem>>, %arg4: memref<64x32xbf16, #tpu.memory_space<vmem>>, %arg5: memref<3x128xf32, #tpu.memory_space<vmem>>, %arg6: memref<16x32xf32, #tpu.memory_space<vmem>>) attributes {dimension_semantics = [], scalar_prefetch = 0 : i64, scratch_operands = 0 : i64, tpu.core_type = #tpu.core_type<tc>} {
    %c0 = arith.constant 0 : index
    %c0_0 = arith.constant 0 : index
    %0 = vector.load %arg0[%c0, %c0_0] : memref<16x32xf32, #tpu.memory_space<vmem>>, vector<16x32xf32>
    %1 = arith.truncf %0 : vector<16x32xf32> to vector<16x32xbf16>
    %c0_1 = arith.constant 0 : index
    %c0_2 = arith.constant 0 : index
    %2 = vector.load %arg2[%c0_1, %c0_2] : memref<32x128xbf16, #tpu.memory_space<vmem>>, vector<32x128xbf16>
    %3 = vector.extract_strided_slice %2 {offsets = [0, 0], sizes = [32, 96], strides = [1, 1]} : vector<32x128xbf16> to vector<32x96xbf16>
    %4 = vector.extract_strided_slice %2 {offsets = [0, 96], sizes = [32, 32], strides = [1, 1]} : vector<32x128xbf16> to vector<32x32xbf16>
    %c0_3 = arith.constant 0 : index
    %c0_4 = arith.constant 0 : index
    %5 = vector.load %arg5[%c0_3, %c0_4] : memref<3x128xf32, #tpu.memory_space<vmem>>, vector<3x128xf32>
    %6 = vector.extract_strided_slice %5 {offsets = [0, 0], sizes = [1, 96], strides = [1, 1]} : vector<3x128xf32> to vector<1x96xf32>
    %7 = vector.extract_strided_slice %5 {offsets = [0, 96], sizes = [1, 32], strides = [1, 1]} : vector<3x128xf32> to vector<1x32xf32>
    %8 = vector.extract_strided_slice %5 {offsets = [1, 0], sizes = [1, 64], strides = [1, 1]} : vector<3x128xf32> to vector<1x64xf32>
    %9 = vector.extract_strided_slice %5 {offsets = [1, 64], sizes = [1, 32], strides = [1, 1]} : vector<3x128xf32> to vector<1x32xf32>
    %10 = vector.extract_strided_slice %5 {offsets = [1, 96], sizes = [1, 32], strides = [1, 1]} : vector<3x128xf32> to vector<1x32xf32>
    %11 = vector.extract_strided_slice %5 {offsets = [2, 0], sizes = [1, 32], strides = [1, 1]} : vector<3x128xf32> to vector<1x32xf32>
    %12 = vector.extract_strided_slice %5 {offsets = [2, 32], sizes = [1, 32], strides = [1, 1]} : vector<3x128xf32> to vector<1x32xf32>
    %13 = vector.extract_strided_slice %5 {offsets = [2, 64], sizes = [1, 32], strides = [1, 1]} : vector<3x128xf32> to vector<1x32xf32>
    %cst = arith.constant dense<0.000000e+00> : vector<16x96xf32>
    %14 = tpu.matmul %1, %3, %cst {dimension_numbers = #tpu.dot_dimension_numbers<[1], [0], [0], [1], [0, 0, 1, 1], [], []>} : vector<16x32xbf16>, vector<32x96xbf16>, vector<16x96xf32> -> vector<16x96xf32>
    %15 = vector.broadcast %6 : vector<1x96xf32> to vector<16x96xf32>
    %16 = arith.addf %14, %15 : vector<16x96xf32>
    %17 = vector.extract_strided_slice %16 {offsets = [0, 0], sizes = [16, 8], strides = [1, 1]} : vector<16x96xf32> to vector<16x8xf32>
    %18 = vector.shape_cast %17 : vector<16x8xf32> to vector<1x2x8x8xf32>
    %19 = vector.extract_strided_slice %16 {offsets = [0, 8], sizes = [16, 8], strides = [1, 1]} : vector<16x96xf32> to vector<16x8xf32>
    %20 = vector.shape_cast %19 : vector<16x8xf32> to vector<1x2x8x8xf32>
    %21 = vector.extract_strided_slice %16 {offsets = [0, 16], sizes = [16, 8], strides = [1, 1]} : vector<16x96xf32> to vector<16x8xf32>
    %22 = vector.shape_cast %21 : vector<16x8xf32> to vector<1x2x8x8xf32>
    %23 = vector.extract_strided_slice %16 {offsets = [0, 24], sizes = [16, 8], strides = [1, 1]} : vector<16x96xf32> to vector<16x8xf32>
    %24 = vector.shape_cast %23 : vector<16x8xf32> to vector<1x2x8x8xf32>
    %25 = tpu.concatenate %18, %20, %22, %24 in 0 : vector<1x2x8x8xf32>, vector<1x2x8x8xf32>, vector<1x2x8x8xf32>, vector<1x2x8x8xf32> -> vector<4x2x8x8xf32>
    %26 = vector.shape_cast %25 : vector<4x2x8x8xf32> to vector<8x8x8xf32>
    %27 = arith.truncf %26 : vector<8x8x8xf32> to vector<8x8x8xbf16>
    %28 = vector.extract_strided_slice %16 {offsets = [0, 32], sizes = [16, 8], strides = [1, 1]} : vector<16x96xf32> to vector<16x8xf32>
    %29 = vector.shape_cast %28 : vector<16x8xf32> to vector<1x2x8x8xf32>
    %30 = vector.extract_strided_slice %16 {offsets = [0, 40], sizes = [16, 8], strides = [1, 1]} : vector<16x96xf32> to vector<16x8xf32>
    %31 = vector.shape_cast %30 : vector<16x8xf32> to vector<1x2x8x8xf32>
    %32 = vector.extract_strided_slice %16 {offsets = [0, 48], sizes = [16, 8], strides = [1, 1]} : vector<16x96xf32> to vector<16x8xf32>
    %33 = vector.shape_cast %32 : vector<16x8xf32> to vector<1x2x8x8xf32>
    %34 = vector.extract_strided_slice %16 {offsets = [0, 56], sizes = [16, 8], strides = [1, 1]} : vector<16x96xf32> to vector<16x8xf32>
    %35 = vector.shape_cast %34 : vector<16x8xf32> to vector<1x2x8x8xf32>
    %36 = tpu.concatenate %29, %31, %33, %35 in 0 : vector<1x2x8x8xf32>, vector<1x2x8x8xf32>, vector<1x2x8x8xf32>, vector<1x2x8x8xf32> -> vector<4x2x8x8xf32>
    %37 = vector.shape_cast %36 : vector<4x2x8x8xf32> to vector<8x8x8xf32>
    %38 = arith.truncf %37 : vector<8x8x8xf32> to vector<8x8x8xbf16>
    %39 = vector.extract_strided_slice %16 {offsets = [0, 64], sizes = [16, 8], strides = [1, 1]} : vector<16x96xf32> to vector<16x8xf32>
    %40 = vector.shape_cast %39 : vector<16x8xf32> to vector<1x2x8x8xf32>
    %41 = vector.extract_strided_slice %16 {offsets = [0, 72], sizes = [16, 8], strides = [1, 1]} : vector<16x96xf32> to vector<16x8xf32>
    %42 = vector.shape_cast %41 : vector<16x8xf32> to vector<1x2x8x8xf32>
    %43 = vector.extract_strided_slice %16 {offsets = [0, 80], sizes = [16, 8], strides = [1, 1]} : vector<16x96xf32> to vector<16x8xf32>
    %44 = vector.shape_cast %43 : vector<16x8xf32> to vector<1x2x8x8xf32>
    %45 = vector.extract_strided_slice %16 {offsets = [0, 88], sizes = [16, 8], strides = [1, 1]} : vector<16x96xf32> to vector<16x8xf32>
    %46 = vector.shape_cast %45 : vector<16x8xf32> to vector<1x2x8x8xf32>
    %47 = tpu.concatenate %40, %42, %44, %46 in 0 : vector<1x2x8x8xf32>, vector<1x2x8x8xf32>, vector<1x2x8x8xf32>, vector<1x2x8x8xf32> -> vector<4x2x8x8xf32>
    %48 = vector.shape_cast %47 : vector<4x2x8x8xf32> to vector<8x8x8xf32>
    %49 = arith.truncf %48 : vector<8x8x8xf32> to vector<8x8x8xbf16>
    %c0_5 = arith.constant 0 : index
    %c0_6 = arith.constant 0 : index
    %c0_7 = arith.constant 0 : index
    %50 = vector.load %arg1[%c0_5, %c0_6, %c0_7] : memref<2x1x8xf32, #tpu.memory_space<vmem>>, vector<2x1x8xf32>
    %cst_8 = arith.constant 0.000000e+00 : f32
    %51 = vector.broadcast %cst_8 : f32 to vector<2x1x8xf32>
    %52 = arith.cmpf oeq, %50, %51 : vector<2x1x8xf32>
    %cst_9 = arith.constant -1.000000e+10 : f32
    %cst_10 = arith.constant 0.000000e+00 : f32
    %53 = vector.broadcast %cst_9 : f32 to vector<2x1x8xf32>
    %54 = vector.broadcast %cst_10 : f32 to vector<2x1x8xf32>
    %55 = arith.select %52, %53, %54 : vector<2x1x8xi1>, vector<2x1x8xf32>
    %56 = vector.shape_cast %55 : vector<2x1x8xf32> to vector<1x2x1x8xf32>
    %57 = vector.shape_cast %56 : vector<1x2x1x8xf32> to vector<1x2x1x8xf32>
    %58 = vector.broadcast %57 : vector<1x2x1x8xf32> to vector<4x2x8x8xf32>
    %59 = vector.shape_cast %58 : vector<4x2x8x8xf32> to vector<8x8x8xf32>
    "tpu.trace_start"() <{level = 10 : i32, message = "nqd,nkd->nqk"}> : () -> ()
    %cst_11 = arith.constant dense<0.000000e+00> : vector<8x8x8xf32>
    %60 = tpu.matmul %27, %38, %cst_11 {dimension_numbers = #tpu.dot_dimension_numbers<[2], [2], [1], [1], [0, 0, 0, 1, 1, 1], [0], [0]>} : vector<8x8x8xbf16>, vector<8x8x8xbf16>, vector<8x8x8xf32> -> vector<8x8x8xf32>
    "tpu.trace_stop"() : () -> ()
    %61 = arith.addf %60, %59 : vector<8x8x8xf32>
    %cst_12 = arith.constant dense<0xFF800000> : vector<8x8xf32>
    %62 = vector.multi_reduction <maximumf>, %61, %cst_12 [2] : vector<8x8x8xf32> to vector<8x8xf32>
    %63 = vector.shape_cast %62 : vector<8x8xf32> to vector<8x8x1xf32>
    %64 = vector.broadcast %63 : vector<8x8x1xf32> to vector<8x8x8xf32>
    %65 = arith.subf %61, %64 : vector<8x8x8xf32>
    %66 = math.exp %65 : vector<8x8x8xf32>
    %cst_13 = arith.constant dense<0.000000e+00> : vector<8x8xf32>
    %67 = vector.multi_reduction <add>, %66, %cst_13 [2] : vector<8x8x8xf32> to vector<8x8xf32>
    %68 = vector.shape_cast %67 : vector<8x8xf32> to vector<8x8x1xf32>
    %69 = tpu.reciprocal %68 {approx = true} : vector<8x8x1xf32> -> vector<8x8x1xf32>
    %70 = vector.broadcast %69 : vector<8x8x1xf32> to vector<8x8x8xf32>
    %71 = arith.mulf %66, %70 : vector<8x8x8xf32>
    %72 = arith.truncf %71 : vector<8x8x8xf32> to vector<8x8x8xbf16>
    "tpu.trace_start"() <{level = 10 : i32, message = "nqk,nkd->nqd"}> : () -> ()
    %cst_14 = arith.constant dense<0.000000e+00> : vector<8x8x8xf32>
    %73 = tpu.matmul %72, %49, %cst_14 {dimension_numbers = #tpu.dot_dimension_numbers<[2], [1], [1], [2], [0, 0, 0, 1, 1, 2], [0], [0]>} : vector<8x8x8xbf16>, vector<8x8x8xbf16>, vector<8x8x8xf32> -> vector<8x8x8xf32>
    "tpu.trace_stop"() : () -> ()
    %74 = vector.shape_cast %73 : vector<8x8x8xf32> to vector<4x16x8xf32>
    %75 = vector.extract_strided_slice %74 {offsets = [0, 0, 0], sizes = [1, 16, 8], strides = [1, 1, 1]} : vector<4x16x8xf32> to vector<1x16x8xf32>
    %76 = vector.shape_cast %75 : vector<1x16x8xf32> to vector<16x8xf32>
    %77 = vector.extract_strided_slice %74 {offsets = [1, 0, 0], sizes = [1, 16, 8], strides = [1, 1, 1]} : vector<4x16x8xf32> to vector<1x16x8xf32>
    %78 = vector.shape_cast %77 : vector<1x16x8xf32> to vector<16x8xf32>
    %79 = vector.extract_strided_slice %74 {offsets = [2, 0, 0], sizes = [1, 16, 8], strides = [1, 1, 1]} : vector<4x16x8xf32> to vector<1x16x8xf32>
    %80 = vector.shape_cast %79 : vector<1x16x8xf32> to vector<16x8xf32>
    %81 = vector.extract_strided_slice %74 {offsets = [3, 0, 0], sizes = [1, 16, 8], strides = [1, 1, 1]} : vector<4x16x8xf32> to vector<1x16x8xf32>
    %82 = vector.shape_cast %81 : vector<1x16x8xf32> to vector<16x8xf32>
    %83 = tpu.concatenate %76, %78, %80, %82 in 1 : vector<16x8xf32>, vector<16x8xf32>, vector<16x8xf32>, vector<16x8xf32> -> vector<16x32xf32>
    %84 = arith.truncf %83 : vector<16x32xf32> to vector<16x32xbf16>
    %cst_15 = arith.constant dense<0.000000e+00> : vector<16x32xf32>
    %85 = tpu.matmul %84, %4, %cst_15 {dimension_numbers = #tpu.dot_dimension_numbers<[1], [0], [0], [1], [0, 0, 1, 1], [], []>} : vector<16x32xbf16>, vector<32x32xbf16>, vector<16x32xf32> -> vector<16x32xf32>
    %86 = vector.broadcast %7 : vector<1x32xf32> to vector<16x32xf32>
    %87 = arith.addf %85, %86 : vector<16x32xf32>
    %88 = arith.addf %0, %87 : vector<16x32xf32>
    %cst_16 = arith.constant dense<0.000000e+00> : vector<16xf32>
    %89 = vector.multi_reduction <add>, %88, %cst_16 [1] : vector<16x32xf32> to vector<16xf32>
    %90 = vector.shape_cast %89 : vector<16xf32> to vector<16x1xf32>
    %cst_17 = arith.constant 3.200000e+01 : f32
    %91 = vector.broadcast %cst_17 : f32 to vector<16x1xf32>
    %92 = arith.divf %90, %91 : vector<16x1xf32>
    %93 = vector.broadcast %92 : vector<16x1xf32> to vector<16x32xf32>
    %94 = arith.subf %88, %93 : vector<16x32xf32>
    %95 = arith.mulf %94, %94 : vector<16x32xf32>
    %cst_18 = arith.constant dense<0.000000e+00> : vector<16xf32>
    %96 = vector.multi_reduction <add>, %95, %cst_18 [1] : vector<16x32xf32> to vector<16xf32>
    %97 = vector.shape_cast %96 : vector<16xf32> to vector<16x1xf32>
    %cst_19 = arith.constant 3.200000e+01 : f32
    %98 = vector.broadcast %cst_19 : f32 to vector<16x1xf32>
    %99 = arith.divf %97, %98 : vector<16x1xf32>
    %100 = vector.broadcast %92 : vector<16x1xf32> to vector<16x32xf32>
    %101 = arith.subf %88, %100 : vector<16x32xf32>
    %cst_20 = arith.constant 9.99999974E-6 : f32
    %102 = vector.broadcast %cst_20 : f32 to vector<16x1xf32>
    %103 = arith.addf %99, %102 : vector<16x1xf32>
    %104 = math.rsqrt %103 : vector<16x1xf32>
    %105 = vector.broadcast %104 : vector<16x1xf32> to vector<16x32xf32>
    %106 = arith.mulf %101, %105 : vector<16x32xf32>
    %107 = vector.broadcast %10 : vector<1x32xf32> to vector<16x32xf32>
    %108 = arith.mulf %106, %107 : vector<16x32xf32>
    %109 = vector.broadcast %11 : vector<1x32xf32> to vector<16x32xf32>
    %110 = arith.addf %108, %109 : vector<16x32xf32>
    %111 = arith.truncf %110 : vector<16x32xf32> to vector<16x32xbf16>
    %c0_21 = arith.constant 0 : index
    %c0_22 = arith.constant 0 : index
    %112 = vector.load %arg3[%c0_21, %c0_22] : memref<32x64xbf16, #tpu.memory_space<vmem>>, vector<32x64xbf16>
    %cst_23 = arith.constant dense<0.000000e+00> : vector<16x64xf32>
    %113 = tpu.matmul %111, %112, %cst_23 {dimension_numbers = #tpu.dot_dimension_numbers<[1], [0], [0], [1], [0, 0, 1, 1], [], []>} : vector<16x32xbf16>, vector<32x64xbf16>, vector<16x64xf32> -> vector<16x64xf32>
    %114 = vector.broadcast %8 : vector<1x64xf32> to vector<16x64xf32>
    %115 = arith.addf %113, %114 : vector<16x64xf32>
    %cst_24 = arith.constant 0.000000e+00 : f32
    %116 = vector.broadcast %cst_24 : f32 to vector<16x64xf32>
    %117 = arith.maximumf %115, %116 : vector<16x64xf32>
    %118 = arith.truncf %117 : vector<16x64xf32> to vector<16x64xbf16>
    %c0_25 = arith.constant 0 : index
    %c0_26 = arith.constant 0 : index
    %119 = vector.load %arg4[%c0_25, %c0_26] : memref<64x32xbf16, #tpu.memory_space<vmem>>, vector<64x32xbf16>
    %cst_27 = arith.constant dense<0.000000e+00> : vector<16x32xf32>
    %120 = tpu.matmul %118, %119, %cst_27 {dimension_numbers = #tpu.dot_dimension_numbers<[1], [0], [0], [1], [0, 0, 1, 1], [], []>} : vector<16x64xbf16>, vector<64x32xbf16>, vector<16x32xf32> -> vector<16x32xf32>
    %121 = vector.broadcast %9 : vector<1x32xf32> to vector<16x32xf32>
    %122 = arith.addf %120, %121 : vector<16x32xf32>
    %123 = arith.addf %110, %122 : vector<16x32xf32>
    %cst_28 = arith.constant dense<0.000000e+00> : vector<16xf32>
    %124 = vector.multi_reduction <add>, %123, %cst_28 [1] : vector<16x32xf32> to vector<16xf32>
    %125 = vector.shape_cast %124 : vector<16xf32> to vector<16x1xf32>
    %cst_29 = arith.constant 3.200000e+01 : f32
    %126 = vector.broadcast %cst_29 : f32 to vector<16x1xf32>
    %127 = arith.divf %125, %126 : vector<16x1xf32>
    %128 = vector.broadcast %127 : vector<16x1xf32> to vector<16x32xf32>
    %129 = arith.subf %123, %128 : vector<16x32xf32>
    %130 = arith.mulf %129, %129 : vector<16x32xf32>
    %cst_30 = arith.constant dense<0.000000e+00> : vector<16xf32>
    %131 = vector.multi_reduction <add>, %130, %cst_30 [1] : vector<16x32xf32> to vector<16xf32>
    %132 = vector.shape_cast %131 : vector<16xf32> to vector<16x1xf32>
    %cst_31 = arith.constant 3.200000e+01 : f32
    %133 = vector.broadcast %cst_31 : f32 to vector<16x1xf32>
    %134 = arith.divf %132, %133 : vector<16x1xf32>
    %135 = vector.broadcast %127 : vector<16x1xf32> to vector<16x32xf32>
    %136 = arith.subf %123, %135 : vector<16x32xf32>
    %cst_32 = arith.constant 9.99999974E-6 : f32
    %137 = vector.broadcast %cst_32 : f32 to vector<16x1xf32>
    %138 = arith.addf %134, %137 : vector<16x1xf32>
    %139 = math.rsqrt %138 : vector<16x1xf32>
    %140 = vector.broadcast %139 : vector<16x1xf32> to vector<16x32xf32>
    %141 = arith.mulf %136, %140 : vector<16x32xf32>
    %142 = vector.broadcast %12 : vector<1x32xf32> to vector<16x32xf32>
    %143 = arith.mulf %141, %142 : vector<16x32xf32>
    %144 = vector.broadcast %13 : vector<1x32xf32> to vector<16x32xf32>
    %145 = arith.addf %143, %144 : vector<16x32xf32>
    %c0_33 = arith.constant 0 : index
    %c0_34 = arith.constant 0 : index
    %146 = vector.load %arg6[%c0_33, %c0_34] : memref<16x32xf32, #tpu.memory_space<vmem>>, vector<16x32xf32>
    tpu.vector_store %arg6[%c0_33, %c0_34], %145 {strides = array<i32>} : memref<16x32xf32, #tpu.memory_space<vmem>>, vector<16x32xf32>,
    return
  }
}

</mosaic_0001>

<bundles_post_ra>
// kernel: tpu_custom_call.1
= control target key start
LH: loop header
LB: loop body
LE: loop exit
PB: predicated region body
PF: predicated region fallthrough
CT: control target
= control target key end

     0   :  { %v1668_v1 = vmov 0.0   ;;  %vm1669_vm0 = vmmov 0   ;;  %vm49_vm1 = vcmask 261120   ;;  %s2021_s0 = inlined_call_operand.vmem [shape: f32[16,32], index: 0, kind: input, shape index: {}]   ;;  %s2022_s1 = inlined_call_operand.vmem [shape: f32[2,1,8], index: 1, kind: input, shape index: {}]   ;;  %s2023_s2 = inlined_call_operand.vmem [shape: bf16[32,128], index: 2, kind: input, shape index: {}]   ;;  %s2024_s3 = inlined_call_operand.vmem [shape: bf16[32,64], index: 3, kind: input, shape index: {}]   ;;  %s2025_s4 = inlined_call_operand.vmem [shape: bf16[64,32], index: 4, kind: input, shape index: {}]   ;;  %s2026_s5 = inlined_call_operand.vmem [shape: f32[3,128], index: 5, kind: input, shape index: {}]   ;;  %s2027_s6 = inlined_call_operand.hbm [shape: f32[16,32], index: 6, kind: output, shape index: {}]  }
   0x1   :  { %v1719_v0 = vld [vmem:[%s2023_s2] sm:$0xff]   ;;  %1421 = vmatprep.subr.bf16.mxu0 %v1668_v1  ;;  %1429 = vmatprep.subr.bf16.mxu1 %v1668_v1  ;;  %v1727_v2 = vld [vmem:[%s2023_s2 + $0x8] sm:$0xff]  }
   0x2   :  { %1422 = vmatpush3.bf16.msra.mxu0 %v1719_v0  ;;  %1425 = vmatprep.mubr.msk.bf16.mxu0 %vm1669_vm0, %v1668_v1  ;;  %v1734_v3 = vld [vmem:[%s2021_s0] sm:$0xff]  ;;  %v1739_v4 = vld [vmem:[%s2021_s0 + $0x8] sm:$0xff] }
   0x3   :  { %1423 = vmatprep.subr.bf16.mxu0 %v1668_v1  ;;  %1431 = vmatprep.mubr.msk.bf16.mxu1 %vm1669_vm0, %v1668_v1  ;;  %v27_v5 = vpack.c.bf16 %v1739_v4, %v1734_v3 }
   0x6   :  { %1424 = vmatpush3.bf16.msra.mxu0 %v1727_v2 }
   0x7   :  { %1435 = vmatprep.subr.bf16.mxu0 %v1668_v1 }
   0x8   :  { %11 = vsyncpa [#allocation3], 0  ;;  %v33_v6 = vlaneseq  ;;  %v1759_v9 = vld [vmem:[%s2026_s5] sm:$0x7]  ;;  %s1670_s29 = smov 104   ;;  %s1671_s30 = smov 120  }
   0x9   :  { %1426 = vmatmul.mubr.msk.bf16.vlgmr.msra.gmra.mrb[0].mxu0 %vm49_vm1, %v27_v5  ;;  %s1672_s5 = smov 96   ;;  %s1673_s7 = smov 112   ;;  %vm143_vm2 = vcmask 64512   ;;  %vm634_vm3 = vcmask 1043456   ;;  %v122_v55 = vld [vmem:[%s2022_s1] sm:$0x1] }
   0xa   :  { %1437 = vmatprep.mubr.msk.bf16.mxu0 %vm1669_vm0, %v1668_v1  ;;  %v1751_v7 = vshrl.u32 %v33_v6, 7  ;;  %s1674_s8 = smov 64   ;;  %vm124_vm4 = vcmp.eq.f32.partialorder %v122_v55, 0.0  ;;  %v123_v56 = vld [vmem:[%s2022_s1 + $0x1] sm:$0x1]  ;;  %s1675_s1 = smov 32  }
   0xb   :  { %v126_v57 = vsel %vm124_vm4, -1e+10, %v1668_v1  ;;  %vm125_vm5 = vcmp.eq.f32.partialorder %v123_v56, 0.0  ;;  %s1676_s13 = smov 8   ;;  %s1677_s14 = smov 16   ;;  %vm1040_vm6 = vcmask 130048  }
   0xc   :  { %v1754_v8 = vsub.s32 0, %v1751_v7  ;;  %v127_v59 = vsel %vm125_vm5, -1e+10, %v1668_v1  ;;  %s1678_s15 = smov 24   ;;  %vm1043_vm7 = vcmask 195584   ;;  %vm1245_vm8 = vcmask 523264  }
   0xe   :  { %v1763_v10 = vrot.slane %v1759_v9, %v1754_v8  ;;  %v133_v58 = vrot.slane %v126_v57, %v1754_v8  ;;  %v137_v63 = vrot.slane %v127_v59, %v1754_v8 }
  0xdc   :  { %v87_v11 = vpop.f32.mrb[0].mxu0 }
  0xdd   :  { %v1427_v12 = vpop.f32.mrb[1].mxu0  ;;  %v88_v14 = vadd.f32 %v87_v11, %v1763_v10 }
  0xde   :  { %v90_v13 = vpop.f32.mrb[2].mxu0 }
  0xdf   :  { %v91_v15 = vadd.f32 %v90_v13, %v1763_v10  ;;  %v1428_v16 = vpop.f32.mrb[3].mxu0  ;;  %v114_v18 = vpack.c.bf16 %v88_v14, %v88_v14 }
  0xe1   :  { %v1576_v17 = vpack.i.bf16 %v91_v15, %v88_v14  ;;  %v115_v19 = vpack.c.bf16 %v91_v15, %v91_v15 }
  0xe3   :  { %1577 = vrot.lane.b32.xlu1 %v1576_v17, %s1670_s29  ;;  %1567 = vrot.lane.b32.xlu0 %v1576_v17, %s1671_s30 }
  0xe7   :  { %141 = vrot.lane.b32.xlu1 %v114_v18, %s1672_s5  ;;  %1572 = vrot.lane.b32.xlu0 %v1576_v17, %s1673_s7 }
  0xeb   :  { %191 = vrot.lane.b32.xlu0 %v115_v19, %s1672_s5 }
 0x155   :  { %v1578_v20 = vpop.permute.xlu1 %1577  ;;  %v1568_v21 = vpop.permute.xlu0 %1567 }
 0x156   :  { %v1570_v22 = vunpack.i.h.bf16 %v1568_v21  ;;  %v1569_v23 = vunpack.i.l.bf16 %v1568_v21  ;;  %v1579_v31 = vunpack.i.l.bf16 %v1578_v20  ;;  %v1580_v34 = vunpack.i.h.bf16 %v1578_v20 }
 0x158   :  { %v1769_v24 = vpack.c.bf16 %v1570_v22, %v1570_v22  ;;  %v1771_v25 = vpack.c.bf16 %v1569_v23, %v1569_v23  ;;  %v1788_v37 = vpack.c.bf16 %v1579_v31, %v1579_v31  ;;  %v1791_v38 = vpack.c.bf16 %v1580_v34, %v1580_v34 }
 0x159   :  { %v142_v26 = vpop.permute.xlu1 %141  ;;  %v1573_v27 = vpop.permute.xlu0 %1572 }
 0x15a   :  { %v1575_v28 = vunpack.i.h.bf16 %v1573_v27  ;;  %v1574_v29 = vunpack.i.l.bf16 %v1573_v27  ;;  %240 = vrot.lane.b32.xlu1 %v1771_v25, %s1672_s5  ;;  %289 = vrot.lane.b32.xlu0 %v1769_v24, %s1672_s5  ;;  %v148_v30 = vsel %vm143_vm2, %v142_v26, 0 }
 0x15b   :  { %1430 = vmatpush3.bf16.xpose.msra.mxu1 %v148_v30 }
 0x15c   :  { %v1778_v32 = vpack.c.bf16 %v1575_v28, %v1575_v28  ;;  %v1780_v33 = vpack.c.bf16 %v1574_v29, %v1574_v29  ;;  %1441 = vmatprep.subr.bf16.mxu1 %v1668_v1 }
 0x15d   :  { %v192_v35 = vpop.permute.xlu0 %191 }
 0x15e   :  { %v197_v36 = vsel %vm143_vm2, %v192_v35, 0  ;;  %338 = vrot.lane.b32.xlu1 %v1780_v33, %s1672_s5  ;;  %387 = vrot.lane.b32.xlu0 %v1778_v32, %s1672_s5 }
 0x15f   :  { %1436 = vmatpush3.bf16.xpose.msra.mxu0 %v197_v36 }
 0x160   :  { %1447 = vmatprep.subr.bf16.mxu0 %v1668_v1 }
 0x162   :  { %1432 = vmatmul.mubr.msk.bf16.vlgmr.msra.gmra.mrb[0].mxu1 %vm143_vm2, %v114_v18  ;;  %436 = vrot.lane.b32.xlu1 %v1788_v37, %s1672_s5 }
 0x163   :  { %485 = vrot.lane.b32.xlu0 %v1791_v38, %s1672_s5  ;;  %1443 = vmatprep.mubr.msk.bf16.mxu1 %vm1669_vm0, %v1668_v1 }
 0x166   :  { %678 = vrot.lane.b32.xlu1 %v115_v19, %s1674_s8  ;;  %1438 = vmatmul.mubr.msk.bf16.vlgmr.msra.gmra.mrb[4].mxu0 %vm143_vm2, %v115_v19 }
 0x167   :  { %629 = vrot.lane.b32.xlu0 %v114_v18, %s1674_s8  ;;  %1449 = vmatprep.mubr.msk.bf16.mxu0 %vm1669_vm0, %v1668_v1 }
 0x1cc   :  { %v241_v39 = vpop.permute.xlu1 %240  ;;  %v290_v40 = vpop.permute.xlu0 %289 }
 0x1cd   :  { %v246_v41 = vsel %vm143_vm2, %v241_v39, 0  ;;  %v295_v42 = vsel %vm143_vm2, %v290_v40, 0 }
 0x1ce   :  { %1442 = vmatpush3.bf16.xpose.msra.mxu1 %v246_v41  ;;  %1448 = vmatpush3.bf16.xpose.msra.mxu0 %v295_v42 }
 0x1cf   :  { %1453 = vmatprep.subr.bf16.mxu1 %v1668_v1  ;;  %1459 = vmatprep.subr.bf16.mxu0 %v1668_v1 }
 0x1d0   :  { %v339_v43 = vpop.permute.xlu1 %338  ;;  %v388_v44 = vpop.permute.xlu0 %387 }
 0x1d1   :  { %v344_v45 = vsel %vm143_vm2, %v339_v43, 0  ;;  %v393_v46 = vsel %vm143_vm2, %v388_v44, 0 }
 0x1d4   :  { %v437_v47 = vpop.permute.xlu1 %436 }
 0x1d5   :  { %1444 = vmatmul.mubr.msk.bf16.vlgmr.msra.gmra.mrb[4].mxu1 %vm143_vm2, %v1771_v25  ;;  %1450 = vmatmul.mubr.msk.bf16.vlgmr.msra.gmra.mrb[8].mxu0 %vm143_vm2, %v1769_v24  ;;  %v486_v48 = vpop.permute.xlu0 %485  ;;  %v442_v49 = vsel %vm143_vm2, %v437_v47, 0 }
 0x1d6   :  { %1454 = vmatpush3.bf16.xpose.msra.mxu1 %v344_v45  ;;  %1460 = vmatpush3.bf16.xpose.msra.mxu0 %v393_v46  ;;  %v491_v50 = vsel %vm143_vm2, %v486_v48, 0 }
 0x1d7   :  { %1455 = vmatprep.mubr.msk.bf16.mxu1 %vm1669_vm0, %v1668_v1  ;;  %1461 = vmatprep.mubr.msk.bf16.mxu0 %vm1669_vm0, %v1668_v1 }
 0x1d8   :  { %1465 = vmatprep.subr.bf16.mxu1 %v1668_v1  ;;  %1471 = vmatprep.subr.bf16.mxu0 %v1668_v1  ;;  %v679_v51 = vpop.permute.xlu1 %678 }
 0x1d9   :  { %v630_v52 = vpop.permute.xlu0 %629  ;;  %v684_v53 = vsel %vm634_vm3, %v679_v51, 0 }
 0x1da   :  { %v636_v54 = vsel %vm634_vm3, %v630_v52, 0 }
 0x1dd   :  { %1456 = vmatmul.mubr.msk.bf16.vlgmr.msra.gmra.mrb[8].mxu1 %vm143_vm2, %v1780_v33  ;;  %1462 = vmatmul.mubr.msk.bf16.vlgmr.msra.gmra.mrb[12].mxu0 %vm143_vm2, %v1778_v32 }
 0x1de   :  { %1466 = vmatpush3.bf16.xpose.msra.mxu1 %v442_v49  ;;  %1472 = vmatpush3.bf16.xpose.msra.mxu0 %v491_v50 }
 0x1df   :  { %1467 = vmatprep.mubr.msk.bf16.mxu1 %vm1669_vm0, %v1668_v1  ;;  %1473 = vmatprep.mubr.msk.bf16.mxu0 %vm1669_vm0, %v1668_v1 }
 0x1e0   :  { %1477 = vmatprep.subr.bf16.mxu1 %v1668_v1  ;;  %1483 = vmatprep.subr.bf16.mxu0 %v1668_v1 }
 0x1e5   :  { %1468 = vmatmul.mubr.msk.bf16.vlgmr.msra.gmra.mrb[12].mxu1 %vm143_vm2, %v1788_v37  ;;  %1474 = vmatmul.mubr.msk.bf16.vlgmr.msra.gmra.mrb[16].mxu0 %vm143_vm2, %v1791_v38 }
 0x1e6   :  { %1478 = vmatpush3.bf16.msra.mxu1 %v636_v54  ;;  %1484 = vmatpush3.bf16.msra.mxu0 %v684_v53 }
 0x1e7   :  { %1479 = vmatprep.mubr.msk.bf16.mxu1 %vm1669_vm0, %v1668_v1  ;;  %1485 = vmatprep.mubr.msk.bf16.mxu0 %vm1669_vm0, %v1668_v1 }
 0x1e8   :  { %1489 = vmatprep.subr.bf16.mxu1 %v1668_v1  ;;  %1495 = vmatprep.subr.bf16.mxu0 %v1668_v1 }
 0x235   :  { %v184_v60 = vpop.f32.mrb[0].mxu1 }
 0x236   :  { %v185_v61 = vadd.f32 %v184_v60, %v133_v58  ;;  %v1433_v62 = vpop.f32.mrb[1].mxu1 }
 0x237   :  { %v187_v5 = vpop.f32.mrb[2].mxu1 }
 0x238   :  { %v1434_v6 = vpop.f32.mrb[3].mxu1  ;;  %v533_v11 = vsel %vm143_vm2, %v185_v61, -inf }
 0x239   :  { %534 = vmax.xlane.f32.xlu1 %v533_v11  ;;  %v233_v12 = vpop.f32.mrb[4].mxu0 }
 0x23a   :  { %v234_v13 = vadd.f32 %v233_v12, %v137_v63  ;;  %v1439_v14 = vpop.f32.mrb[5].mxu0 }
 0x23b   :  { %v236_v15 = vpop.f32.mrb[6].mxu0 }
 0x23c   :  { %v1440_v16 = vpop.f32.mrb[7].mxu0  ;;  %v536_v17 = vsel %vm143_vm2, %v234_v13, -inf }
 0x23d   :  { %537 = vmax.xlane.f32.xlu0 %v536_v17 }
 0x2a8   :  { %v282_v18 = vpop.f32.mrb[4].mxu1  ;;  %v331_v19 = vpop.f32.mrb[8].mxu0 }
 0x2a9   :  { %v283_v20 = vadd.f32 %v282_v18, %v133_v58  ;;  %v332_v21 = vadd.f32 %v331_v19, %v137_v63  ;;  %v1445_v22 = vpop.f32.mrb[5].mxu1  ;;  %v1451_v23 = vpop.f32.mrb[9].mxu0 }
 0x2aa   :  { %v285_v8 = vpop.f32.mrb[6].mxu1  ;;  %v334_v26 = vpop.f32.mrb[10].mxu0 }
 0x2ab   :  { %v1446_v27 = vpop.f32.mrb[7].mxu1  ;;  %v1452_v28 = vpop.f32.mrb[11].mxu0  ;;  %v539_v29 = vsel %vm143_vm2, %v283_v20, -inf  ;;  %v542_v30 = vsel %vm143_vm2, %v332_v21, -inf }
 0x2ac   :  { %540 = vmax.xlane.f32.xlu0 %v539_v29  ;;  %543 = vmax.xlane.f32.xlu1 %v542_v30 }
 0x2b0   :  { %v380_v31 = vpop.f32.mrb[8].mxu1  ;;  %v429_v34 = vpop.f32.mrb[12].mxu0 }
 0x2b1   :  { %v1859_v35 = vadd.f32 %v380_v31, %v133_v58  ;;  %v430_v36 = vadd.f32 %v429_v34, %v137_v63  ;;  %v1457_v39 = vpop.f32.mrb[9].mxu1  ;;  %v1463_v40 = vpop.f32.mrb[13].mxu0 }
 0x2b2   :  { %v383_v41 = vpop.f32.mrb[10].mxu1  ;;  %v432_v42 = vpop.f32.mrb[14].mxu0 }
 0x2b3   :  { %v1458_v43 = vpop.f32.mrb[11].mxu1  ;;  %v1464_v44 = vpop.f32.mrb[15].mxu0  ;;  %v545_v45 = vsel %vm143_vm2, %v1859_v35, -inf  ;;  %v548_v46 = vsel %vm143_vm2, %v430_v36, -inf }
 0x2b4   :  { %546 = vmax.xlane.f32.xlu0 %v545_v45  ;;  %549 = vmax.xlane.f32.xlu1 %v548_v46 }
 0x2b8   :  { %v478_v47 = vpop.f32.mrb[12].mxu1  ;;  %v527_v48 = vpop.f32.mrb[16].mxu0 }
 0x2b9   :  { %v1864_v49 = vadd.f32 %v478_v47, %v133_v58  ;;  %v528_v50 = vadd.f32 %v527_v48, %v137_v63  ;;  %v1469_v51 = vpop.f32.mrb[13].mxu1  ;;  %v1475_v52 = vpop.f32.mrb[17].mxu0 }
 0x2ba   :  { %v481_v53 = vpop.f32.mrb[14].mxu1  ;;  %v530_v54 = vpop.f32.mrb[18].mxu0 }
 0x2bb   :  { %v1470_v55 = vpop.f32.mrb[15].mxu1  ;;  %v1476_v56 = vpop.f32.mrb[19].mxu0  ;;  %v551_v57 = vsel %vm143_vm2, %v1864_v49, -inf  ;;  %v554_v59 = vsel %vm143_vm2, %v528_v50, -inf }
 0x2bc   :  { %552 = vmax.xlane.f32.xlu0 %v551_v57  ;;  %555 = vmax.xlane.f32.xlu1 %v554_v59 }
 0x2c6   :  { %v535_v58 = vpop.xlane.xlu1 %534 }
 0x2c7   :  { %v557_v62 = vsub.f32 %v185_v61, %v535_v58 }
 0x2c9   :  { %v565_v5 = vmul.f32 1.442695, %v557_v62 }
 0x2ca   :  { %v538_v60 = vpop.xlane.xlu0 %537 }
 0x2cb   :  { %v558_v63 = vsub.f32 %v234_v13, %v538_v60  ;;  %1604 = vpow2.f32 %v565_v5 }
 0x2cd   :  { %726 = vrot.lane.b32.xlu1 %v1771_v25, %s1674_s8  ;;  %v567_v6 = vmul.f32 1.442695, %v558_v63 }
 0x2cf   :  { %1606 = vpow2.f32 %v567_v6 }
 0x2d2   :  { %774 = vrot.lane.b32.xlu0 %v1769_v24, %s1674_s8 }
 0x2d5   :  { %v1605_v11 = vpop.eup %1604 }
 0x2d6   :  { %v581_v14 = vsel %vm143_vm2, %v1605_v11, 0.0 }
 0x2d9   :  { %v1607_v12 = vpop.eup %1606 }
 0x2da   :  { %v584_v15 = vsel %vm143_vm2, %v1607_v12, 0.0 }
 0x2f1   :  { %582 = vadd.xlane.f32.xlu0 %v581_v14  ;;  %585 = vadd.xlane.f32.xlu1 %v584_v15 }
 0x302   :  { %822 = vrot.lane.b32.xlu1 %v1780_v33, %s1674_s8 }
 0x339   :  { %v541_v24 = vpop.xlane.xlu0 %540  ;;  %v544_v25 = vpop.xlane.xlu1 %543 }
 0x33a   :  { %v559_v16 = vsub.f32 %v283_v20, %v541_v24  ;;  %v560_v61 = vsub.f32 %v332_v21, %v544_v25 }
 0x33c   :  { %v569_v13 = vmul.f32 1.442695, %v559_v16  ;;  %v571_v17 = vmul.f32 1.442695, %v560_v61 }
 0x33e   :  { %1608 = vpow2.f32 %v569_v13 }
 0x33f   :  { %1610 = vpow2.f32 %v571_v17 }
 0x341   :  { %v550_v18 = vpop.xlane.xlu1 %549  ;;  %v547_v34 = vpop.xlane.xlu0 %546 }
 0x342   :  { %v562_v19 = vsub.f32 %v430_v36, %v550_v18  ;;  %v561_v36 = vsub.f32 %v1859_v35, %v547_v34 }
 0x344   :  { %v575_v22 = vmul.f32 1.442695, %v562_v19  ;;  %v573_v40 = vmul.f32 1.442695, %v561_v36 }
 0x346   :  { %1612 = vpow2.f32 %v575_v22 }
 0x348   :  { %v1877_v23 = vpop.eup %1608 }
 0x349   :  { %v1879_v8 = vpop.eup %1610  ;;  %v556_v26 = vpop.xlane.xlu1 %555  ;;  %v587_v33 = vsel %vm143_vm2, %v1877_v23, 0.0 }
 0x34a   :  { %v564_v27 = vsub.f32 %v528_v50, %v556_v26  ;;  %588 = vadd.xlane.f32.xlu0 %v587_v33  ;;  %v590_v20 = vsel %vm143_vm2, %v1879_v8, 0.0  ;;  %v553_v39 = vpop.xlane.xlu0 %552 }
 0x34b   :  { %591 = vadd.xlane.f32.xlu1 %v590_v20  ;;  %v563_v41 = vsub.f32 %v1864_v49, %v553_v39 }
 0x34c   :  { %v579_v21 = vmul.f32 1.442695, %v564_v27 }
 0x34d   :  { %v577_v42 = vmul.f32 1.442695, %v563_v41  ;;  %v727_v44 = vpop.permute.xlu1 %726 }
 0x34e   :  { %1614 = vpow2.f32 %v579_v21  ;;  %v775_v43 = vpop.permute.xlu0 %774  ;;  %v732_v54 = vsel %vm634_vm3, %v727_v44, 0 }
 0x34f   :  { %1616 = vpow2.f32 %v573_v40  ;;  %v780_v55 = vsel %vm634_vm3, %v775_v43, 0 }
 0x350   :  { %v1885_v28 = vpop.eup %1612  ;;  %1618 = vpow2.f32 %v577_v42 }
 0x351   :  { %v596_v29 = vsel %vm143_vm2, %v1885_v28, 0.0 }
 0x352   :  { %597 = vadd.xlane.f32.xlu1 %v596_v29 }
 0x358   :  { %v1889_v30 = vpop.eup %1614 }
 0x359   :  { %v602_v31 = vsel %vm143_vm2, %v1889_v30, 0.0  ;;  %v1899_v45 = vpop.eup %1616 }
 0x35a   :  { %603 = vadd.xlane.f32.xlu1 %v602_v31  ;;  %v1903_v35 = vpop.eup %1618 }
 0x360   :  { %870 = vrot.lane.b32.xlu0 %v1778_v32, %s1674_s8  ;;  %v593_v32 = vsel %vm143_vm2, %v1899_v45, 0.0 }
 0x36b   :  { %918 = vrot.lane.b32.xlu1 %v1788_v37, %s1674_s8  ;;  %v599_v37 = vsel %vm143_vm2, %v1903_v35, 0.0 }
 0x36f   :  { %1047 = vrot.lane.b32.xlu1 %v1719_v0, %s1675_s1 }
 0x37e   :  { %v583_v46 = vpop.xlane.xlu0 %582  ;;  %v586_v47 = vpop.xlane.xlu1 %585 }
 0x37f   :  { %1620 = vrcp.f32 %v583_v46  ;;  %594 = vadd.xlane.f32.xlu0 %v593_v32 }
 0x380   :  { %1622 = vrcp.f32 %v586_v47 }
 0x382   :  { %v823_v56 = vpop.permute.xlu1 %822 }
 0x383   :  { %600 = vadd.xlane.f32.xlu0 %v599_v37  ;;  %v828_v14 = vsel %vm634_vm3, %v823_v56, 0 }
 0x389   :  { %v1621_v48 = vpop.eup %1620 }
 0x38a   :  { %v1623_v49 = vpop.eup %1622  ;;  %v613_v50 = vmul.f32 %v1621_v48, %v1605_v11 }
 0x38b   :  { %v614_v51 = vmul.f32 %v1623_v49, %v1607_v12 }
 0x38c   :  { %v621_v52 = vpack.c.bf16 %v613_v50, %v613_v50 }
 0x38d   :  { %v622_v53 = vpack.c.bf16 %v614_v51, %v614_v51 }
 0x38e   :  { %1480 = vmatmul.mubr.msk.bf16.vlgmr.msra.gmra.mrb[16].mxu1 %vm143_vm2, %v621_v52 }
 0x38f   :  { %1486 = vmatmul.mubr.msk.bf16.vlgmr.msra.gmra.mrb[20].mxu0 %vm143_vm2, %v622_v53  ;;  %1490 = vmatpush3.bf16.msra.mxu1 %v732_v54 }
 0x390   :  { %1496 = vmatpush3.bf16.msra.mxu0 %v780_v55  ;;  %1491 = vmatprep.mubr.msk.bf16.mxu1 %vm1669_vm0, %v1668_v1 }
 0x391   :  { %1497 = vmatprep.mubr.msk.bf16.mxu0 %vm1669_vm0, %v1668_v1  ;;  %1501 = vmatprep.subr.bf16.mxu1 %v1668_v1 }
 0x392   :  { %1507 = vmatprep.subr.bf16.mxu0 %v1668_v1 }
 0x399   :  { %966 = vrot.lane.b32.xlu0 %v1791_v38, %s1674_s8 }
 0x3d7   :  { %v589_v57 = vpop.xlane.xlu0 %588 }
 0x3d8   :  { %1624 = vrcp.f32 %v589_v57  ;;  %v592_v59 = vpop.xlane.xlu1 %591 }
 0x3d9   :  { %1626 = vrcp.f32 %v592_v59 }
 0x3db   :  { %v871_v6 = vpop.permute.xlu0 %870 }
 0x3dc   :  { %v876_v38 = vsel %vm634_vm3, %v871_v6, 0 }
 0x3df   :  { %v598_v58 = vpop.xlane.xlu1 %597 }
 0x3e0   :  { %1628 = vrcp.f32 %v598_v58 }
 0x3e2   :  { %v1625_v60 = vpop.eup %1624 }
 0x3e3   :  { %v1627_v62 = vpop.eup %1626  ;;  %v615_v63 = vmul.f32 %v1625_v60, %v1877_v23 }
 0x3e4   :  { %v616_v5 = vmul.f32 %v1627_v62, %v1879_v8 }
 0x3e5   :  { %v623_v11 = vpack.c.bf16 %v615_v63, %v615_v63 }
 0x3e6   :  { %v624_v12 = vpack.c.bf16 %v616_v5, %v616_v5 }
 0x3e7   :  { %1492 = vmatmul.mubr.msk.bf16.vlgmr.msra.gmra.mrb[20].mxu1 %vm143_vm2, %v623_v11  ;;  %v604_v16 = vpop.xlane.xlu1 %603 }
 0x3e8   :  { %1498 = vmatmul.mubr.msk.bf16.vlgmr.msra.gmra.mrb[24].mxu0 %vm143_vm2, %v624_v12  ;;  %1502 = vmatpush3.bf16.msra.mxu1 %v828_v14  ;;  %1630 = vrcp.f32 %v604_v16 }
 0x3e9   :  { %1508 = vmatpush3.bf16.msra.mxu0 %v876_v38  ;;  %1509 = vmatprep.mubr.msk.bf16.mxu0 %vm1669_vm0, %v1668_v1 }
 0x3ea   :  { %1519 = vmatprep.subr.bf16.mxu0 %v1668_v1  ;;  %1503 = vmatprep.mubr.msk.bf16.mxu1 %vm1669_vm0, %v1668_v1  ;;  %v1629_v15 = vpop.eup %1628 }
 0x3eb   :  { %1513 = vmatprep.subr.bf16.mxu1 %v1668_v1  ;;  %v618_v24 = vmul.f32 %v1629_v15, %v1885_v28  ;;  %v919_v33 = vpop.permute.xlu1 %918 }
 0x3ec   :  { %v924_v21 = vsel %vm634_vm3, %v919_v33, 0 }
 0x3ed   :  { %v626_v25 = vpack.c.bf16 %v618_v24, %v618_v24 }
 0x3ef   :  { %v1048_v53 = vpop.permute.xlu1 %1047 }
 0x3f0   :  { %1510 = vmatmul.mubr.msk.bf16.vlgmr.msra.gmra.mrb[28].mxu0 %vm143_vm2, %v626_v25 }
 0x3f1   :  { %1521 = vmatprep.mubr.msk.bf16.mxu0 %vm1669_vm0, %v1668_v1 }
 0x3f2   :  { %v1631_v13 = vpop.eup %1630 }
 0x3f3   :  { %v620_v18 = vmul.f32 %v1631_v13, %v1889_v30 }
 0x3f5   :  { %v628_v8 = vpack.c.bf16 %v620_v18, %v620_v18 }
 0x40c   :  { %v595_v61 = vpop.xlane.xlu0 %594 }
 0x40d   :  { %1632 = vrcp.f32 %v595_v61 }
 0x410   :  { %v601_v17 = vpop.xlane.xlu0 %600 }
 0x411   :  { %1634 = vrcp.f32 %v601_v17 }
 0x414   :  { %v967_v19 = vpop.permute.xlu0 %966 }
 0x415   :  { %v972_v22 = vsel %vm634_vm3, %v967_v19, 0 }
 0x416   :  { %1520 = vmatpush3.bf16.msra.mxu0 %v972_v22 }
 0x417   :  { %v1633_v23 = vpop.eup %1632  ;;  %1533 = vmatprep.subr.bf16.mxu0 %v1668_v1 }
 0x418   :  { %v617_v26 = vmul.f32 %v1633_v23, %v1899_v45 }
 0x419   :  { %1522 = vmatmul.mubr.msk.bf16.vlgmr.msra.gmra.mrb[32].mxu0 %vm143_vm2, %v628_v8 }
 0x41a   :  { %v625_v27 = vpack.c.bf16 %v617_v26, %v617_v26  ;;  %1537 = vmatprep.mubr.msk.bf16.mxu0 %vm1669_vm0, %v1668_v1 }
 0x41b   :  { %v1635_v20 = vpop.eup %1634 }
 0x41c   :  { %1504 = vmatmul.mubr.msk.bf16.vlgmr.msra.gmra.mrb[24].mxu1 %vm143_vm2, %v625_v27  ;;  %v619_v28 = vmul.f32 %v1635_v20, %v1903_v35 }
 0x41d   :  { %1514 = vmatpush3.bf16.msra.mxu1 %v924_v21  ;;  %1515 = vmatprep.mubr.msk.bf16.mxu1 %vm1669_vm0, %v1668_v1 }
 0x41e   :  { %1525 = vmatprep.subr.bf16.mxu1 %v1668_v1  ;;  %v627_v29 = vpack.c.bf16 %v619_v28, %v619_v28 }
 0x424   :  { %1516 = vmatmul.mubr.msk.bf16.vlgmr.msra.gmra.mrb[28].mxu1 %vm143_vm2, %v627_v29 }
 0x425   :  { %1529 = vmatprep.mubr.msk.bf16.mxu1 %vm1669_vm0, %v1668_v1  ;;  %1526 = vmatpush3.bf16.msra.mxu1 %v1048_v53 }
 0x426   :  { %1527 = vmatprep.subr.bf16.mxu1 %v1668_v1 }
 0x461   :  { %v672_v30 = vpop.f32.mrb[16].mxu1 }
 0x462   :  { %v720_v31 = vpop.f32.mrb[20].mxu0  ;;  %v1481_v34 = vpop.f32.mrb[17].mxu1 }
 0x463   :  { %v1487_v36 = vpop.f32.mrb[21].mxu0  ;;  %v675_v39 = vpop.f32.mrb[18].mxu1 }
 0x464   :  { %v723_v40 = vpop.f32.mrb[22].mxu0  ;;  %v1482_v41 = vpop.f32.mrb[19].mxu1 }
 0x465   :  { %v1488_v42 = vpop.f32.mrb[23].mxu0 }
 0x4ba   :  { %v768_v43 = vpop.f32.mrb[20].mxu1 }
 0x4bb   :  { %v816_v44 = vpop.f32.mrb[24].mxu0  ;;  %v1493_v45 = vpop.f32.mrb[21].mxu1 }
 0x4bc   :  { %v1581_v46 = vpack.i.bf16 %v816_v44, %v768_v43  ;;  %v1499_v47 = vpop.f32.mrb[25].mxu0  ;;  %v771_v32 = vpop.f32.mrb[22].mxu1 }
 0x4bd   :  { %v819_v35 = vpop.f32.mrb[26].mxu0  ;;  %v1494_v37 = vpop.f32.mrb[23].mxu1 }
 0x4be   :  { %1582 = vrot.lane.b32.xlu0 %v1581_v46, %s1676_s13  ;;  %v1500_v48 = vpop.f32.mrb[27].mxu0  ;;  %v1598_v37 = vld [vmem:[%s2024_s3] sm:$0xff]  }
 0x4bf   :  { %1534 = vmatpush3.bf16.msra.mxu0 %v1598_v37  ;;  %v1599_v48 = vld [vmem:[%s2024_s3 + $0x8] sm:$0xff]  }
 0x4c0   :  { %1535 = vmatprep.subr.bf16.mxu0 %v1668_v1 }
 0x4c3   :  { %v912_v49 = vpop.f32.mrb[28].mxu0  ;;  %1536 = vmatpush3.bf16.msra.mxu0 %v1599_v48 }
 0x4c4   :  { %v1511_v50 = vpop.f32.mrb[29].mxu0 }
 0x4c5   :  { %v915_v51 = vpop.f32.mrb[30].mxu0  ;;  %v1601_v50 = vld [vmem:[%s2025_s4 + $0x8] sm:$0xff]  }
 0x4c6   :  { %v1512_v52 = vpop.f32.mrb[31].mxu0 }
 0x4ec   :  { %v1008_v0 = vpop.f32.mrb[32].mxu0 }
 0x4ed   :  { %v1523_v54 = vpop.f32.mrb[33].mxu0 }
 0x4ee   :  { %v1011_v55 = vpop.f32.mrb[34].mxu0 }
 0x4ef   :  { %v864_v56 = vpop.f32.mrb[24].mxu1  ;;  %v1524_v57 = vpop.f32.mrb[35].mxu0 }
 0x4f0   :  { %v1586_v59 = vpack.i.bf16 %v912_v49, %v864_v56  ;;  %v1505_v58 = vpop.f32.mrb[25].mxu1  ;;  %v1600_v49 = vld [vmem:[%s2025_s4] sm:$0xff]   ;;  %v1142_v56 = vsub.s32 2, %v1751_v7 }
 0x4f1   :  { %v867_v60 = vpop.f32.mrb[26].mxu1 }
 0x4f2   :  { %v1506_v62 = vpop.f32.mrb[27].mxu1  ;;  %1587 = vrot.lane.b32.xlu1 %v1586_v59, %s1677_s14 }
 0x4f3   :  { %v1143_v62 = vrot.slane %v1759_v9, %v1142_v56 }
 0x4f6   :  { %1049 = vrot.lane.b32.xlu1 %v1727_v2, %s1675_s1 }
 0x4f7   :  { %v960_v63 = vpop.f32.mrb[28].mxu1 }
 0x4f8   :  { %v1591_v5 = vpack.i.bf16 %v1008_v0, %v960_v63  ;;  %v1517_v6 = vpop.f32.mrb[29].mxu1 }
 0x4f9   :  { %v963_v11 = vpop.f32.mrb[30].mxu1 }
 0x4fa   :  { %v1518_v12 = vpop.f32.mrb[31].mxu1  ;;  %1592 = vrot.lane.b32.xlu0 %v1591_v5, %s1678_s15 }
 0x4fe   :  { %1054 = vrot.lane.b32.xlu0 %v1763_v10, %s1675_s1 }
 0x530   :  { %v1583_v38 = vpop.permute.xlu0 %1582 }
 0x531   :  { %v1585_v24 = vunpack.i.h.bf16 %v1583_v38  ;;  %v1584_v25 = vunpack.i.l.bf16 %v1583_v38  ;;  %v1602_v38 = vld [vmem:[%s2025_s4 + $0x10] sm:$0xff]  }
 0x533   :  { %v1039_v13 = vsel %vm143_vm2, %v720_v31, %v1585_v24  ;;  %v1038_v17 = vsel %vm143_vm2, %v672_v30, %v1584_v25 }
 0x564   :  { %v1588_v14 = vpop.permute.xlu1 %1587 }
 0x565   :  { %v1590_v16 = vunpack.i.h.bf16 %v1588_v14  ;;  %v1589_v61 = vunpack.i.l.bf16 %v1588_v14 }
 0x567   :  { %v1042_v10 = vsel %vm1040_vm6, %v1039_v13, %v1590_v16  ;;  %v1041_v22 = vsel %vm1040_vm6, %v1038_v17, %v1589_v61 }
 0x568   :  { %v1050_v15 = vpop.permute.xlu1 %1049 }
 0x569   :  { %1528 = vmatpush3.bf16.msra.mxu1 %v1050_v15 }
 0x56a   :  { %1541 = vmatprep.subr.bf16.mxu1 %v1668_v1 }
 0x56c   :  { %v1593_v2 = vpop.permute.xlu0 %1592 }
 0x56d   :  { %v1595_v18 = vunpack.i.h.bf16 %v1593_v2  ;;  %v1594_v19 = vunpack.i.l.bf16 %v1593_v2 }
 0x56f   :  { %v1045_v23 = vsel %vm1043_vm7, %v1042_v10, %v1595_v18  ;;  %v1044_v8 = vsel %vm1043_vm7, %v1041_v22, %v1594_v19 }
 0x570   :  { %v1046_v26 = vpack.c.bf16 %v1045_v23, %v1044_v8  ;;  %v1055_v33 = vpop.permute.xlu0 %1054 }
 0x572   :  { %1530 = vmatmul.mubr.msk.bf16.vlgmr.msra.gmra.mrb[32].mxu1 %vm49_vm1, %v1046_v26 }
 0x573   :  { %1549 = vmatprep.mubr.msk.bf16.mxu1 %vm1669_vm0, %v1668_v1  ;;  %1542 = vmatpush3.bf16.msra.mxu1 %v1600_v49 }
 0x574   :  { %1543 = vmatprep.subr.bf16.mxu1 %v1668_v1 }
 0x577   :  { %1544 = vmatpush3.bf16.msra.mxu1 %v1601_v50 }
 0x578   :  { %1545 = vmatprep.subr.bf16.mxu1 %v1668_v1 }
 0x57b   :  { %1546 = vmatpush3.bf16.msra.mxu1 %v1602_v38 }
 0x57c   :  { %1547 = vmatprep.subr.bf16.mxu1 %v1668_v1 }
 0x645   :  { %v1094_v27 = vpop.f32.mrb[32].mxu1 }
 0x646   :  { %v1095_v20 = vadd.f32 %v1094_v27, %v1055_v33  ;;  %v1531_v21 = vpop.f32.mrb[33].mxu1 }
 0x647   :  { %v1097_v28 = vpop.f32.mrb[34].mxu1 }
 0x648   :  { %v1098_v29 = vadd.f32 %v1097_v28, %v1055_v33  ;;  %v1532_v31 = vpop.f32.mrb[35].mxu1  ;;  %v1101_v30 = vadd.f32 %v1095_v20, %v1734_v3 }
 0x64a   :  { %v1103_v34 = vsel %vm49_vm1, %v1101_v30, 0.0  ;;  %v1102_v36 = vadd.f32 %v1098_v29, %v1739_v4  ;;  %v1132_v4 = vsub.s32 1, %v1751_v7  ;;  %v1603_v7 = vld [vmem:[%s2025_s4 + $0x18] sm:$0xff]   ;;  %s1679_s4 = smov [#allocation2]  }
 0x64b   :  { %1104 = vadd.xlane.f32.xlu1 %v1103_v34  ;;  %1548 = vmatpush3.bf16.msra.mxu1 %v1603_v7  ;;  %s1336_s27 = sshll.u32 %s1679_s4, 4  ;;  %s1337_s27 = int_to_ptr.vmem [resolvable:$true] %s1336_s27 }
 0x64c   :  { %v1106_v39 = vsel %vm49_vm1, %v1102_v36, 0.0  ;;  %v1133_v35 = vrot.slane %v1759_v9, %v1132_v4  ;;  %s1644_s28 = scalar_lea.vmem %s1337_s27, 256  ;;  %p1649_p1 = scmp.lt.s32.totalorder %s1337_s27, %s1337_s27 }
 0x64d   :  { %1107 = vadd.xlane.f32.xlu0 %v1106_v39  ;;  %p1645_p0 = scmp.ne.s32.totalorder %s1337_s27, %s1644_s28  ;;  %p1650_p2 = scmp.lt.s32.totalorder %s1644_s28, %s1644_s28 }
 0x64f   :  { %p1651_p3 = por %p1650_p2, %p1649_p1 }
 0x651   :  { %p1652_p4 = pnand %p1651_p3, %p1645_p0 }
 0x6d8   :  { %v1105_v40 = vpop.xlane.xlu1 %1104 }
 0x6d9   :  { %v1110_v41 = vmul.f32 0.03125, %v1105_v40 }
 0x6da   :  { %v1108_v42 = vpop.xlane.xlu0 %1107 }
 0x6db   :  { %v1112_v43 = vsub.f32 %v1101_v30, %v1110_v41  ;;  %v1111_v44 = vmul.f32 0.03125, %v1108_v42 }
 0x6dd   :  { %v1113_v45 = vsub.f32 %v1102_v36, %v1111_v44  ;;  %v1114_v46 = vmul.f32 %v1112_v43, %v1112_v43 }
 0x6df   :  { %v1116_v47 = vsel %vm49_vm1, %v1114_v46, 0.0  ;;  %v1115_v32 = vmul.f32 %v1113_v45, %v1113_v45 }
 0x6e0   :  { %1117 = vadd.xlane.f32.xlu0 %v1116_v47 }
 0x6e1   :  { %v1119_v3 = vsel %vm49_vm1, %v1115_v32, 0.0 }
 0x6e2   :  { %1120 = vadd.xlane.f32.xlu1 %v1119_v3 }
 0x6f3   :  { %1242 = vrot.lane.b32.xlu1 %v1133_v35, %s1674_s8 }
 0x6f6   :  { %1135 = vrot.lane.b32.xlu0 %v1133_v35, %s1675_s1 }
 0x76d   :  { %v1118_v51 = vpop.xlane.xlu0 %1117 }
 0x76e   :  { %v1122_v52 = vmul.f32 0.03125, %v1118_v51 }
 0x76f   :  { %v1121_v53 = vpop.xlane.xlu1 %1120 }
 0x770   :  { %v1124_v0 = vadd.f32 1e-05, %v1122_v52  ;;  %v1123_v54 = vmul.f32 0.03125, %v1121_v53 }
 0x771   :  { %v1136_v59 = vpop.permute.xlu0 %1135 }
 0x772   :  { %1636 = vrsqrt.f32 %v1124_v0  ;;  %v1125_v55 = vadd.f32 1e-05, %v1123_v54 }
 0x773   :  { %v1243_v18 = vpop.permute.xlu1 %1242 }
 0x774   :  { %1638 = vrsqrt.f32 %v1125_v55 }
 0x77c   :  { %v1637_v57 = vpop.eup %1636 }
 0x77d   :  { %v1128_v58 = vmul.f32 %v1637_v57, %v1112_v43 }
 0x77e   :  { %v1639_v60 = vpop.eup %1638 }
 0x77f   :  { %v1129_v63 = vmul.f32 %v1639_v60, %v1113_v45  ;;  %v1138_v5 = vmul.f32 %v1136_v59, %v1128_v58 }
 0x781   :  { %v1139_v6 = vmul.f32 %v1136_v59, %v1129_v63  ;;  %v1144_v11 = vadd.f32 %v1143_v62, %v1138_v5 }
 0x783   :  { %v1145_v12 = vadd.f32 %v1143_v62, %v1139_v6 }
 0x785   :  { %v1146_v14 = vpack.c.bf16 %v1145_v12, %v1144_v11 }
 0x787   :  { %1538 = vmatmul.mubr.msk.bf16.vlgmr.msra.gmra.mrb[36].mxu0 %vm49_vm1, %v1146_v14 }
 0x85a   :  { %v1200_v9 = vpop.f32.mrb[36].mxu0 }
 0x85b   :  { %v1201_v15 = vadd.f32 %v1200_v9, %v1133_v35  ;;  %v1539_v24 = vpop.f32.mrb[37].mxu0 }
 0x85c   :  { %v1203_v25 = vpop.f32.mrb[38].mxu0 }
 0x85d   :  { %v1204_v16 = vadd.f32 %v1203_v25, %v1133_v35  ;;  %v1540_v61 = vpop.f32.mrb[39].mxu0  ;;  %v1207_v2 = vmax.f32 %v1201_v15, 0.0 }
 0x85f   :  { %v1208_v13 = vmax.f32 %v1204_v16, 0.0 }
 0x861   :  { %v1209_v17 = vpack.c.bf16 %v1208_v13, %v1207_v2 }
 0x863   :  { %1550 = vmatmul.mubr.msk.bf16.vlgmr.msra.gmra.mrb[36].mxu1 %vm1245_vm8, %v1209_v17 }
 0x936   :  { %v1283_v19 = vpop.f32.mrb[36].mxu1 }
 0x937   :  { %v1284_v10 = vadd.f32 %v1283_v19, %v1243_v18  ;;  %v1551_v1 = vpop.f32.mrb[37].mxu1 }
 0x938   :  { %v1286_v22 = vpop.f32.mrb[38].mxu1 }
 0x939   :  { %v1287_v23 = vadd.f32 %v1286_v22, %v1243_v18  ;;  %v1552_v8 = vpop.f32.mrb[39].mxu1  ;;  %v1290_v26 = vadd.f32 %v1284_v10, %v1144_v11 }
 0x93b   :  { %v1292_v33 = vsel %vm49_vm1, %v1290_v26, 0.0  ;;  %v1291_v27 = vadd.f32 %v1287_v23, %v1145_v12 }
 0x93c   :  { %1293 = vadd.xlane.f32.xlu1 %v1292_v33 }
 0x93d   :  { %v1295_v20 = vsel %vm49_vm1, %v1291_v27, 0.0 }
 0x93e   :  { %1296 = vadd.xlane.f32.xlu0 %v1295_v20 }
 0x9c9   :  { %v1294_v21 = vpop.xlane.xlu1 %1293 }
 0x9ca   :  { %v1298_v28 = vmul.f32 0.03125, %v1294_v21 }
 0x9cb   :  { %v1297_v29 = vpop.xlane.xlu0 %1296 }
 0x9cc   :  { %v1300_v31 = vsub.f32 %v1290_v26, %v1298_v28  ;;  %v1299_v30 = vmul.f32 0.03125, %v1297_v29 }
 0x9ce   :  { %v1301_v34 = vsub.f32 %v1291_v27, %v1299_v30  ;;  %v1302_v36 = vmul.f32 %v1300_v31, %v1300_v31 }
 0x9d0   :  { %v1304_v39 = vsel %vm49_vm1, %v1302_v36, 0.0  ;;  %v1303_v40 = vmul.f32 %v1301_v34, %v1301_v34 }
 0x9d1   :  { %1305 = vadd.xlane.f32.xlu0 %v1304_v39 }
 0x9d2   :  { %v1307_v41 = vsel %vm49_vm1, %v1303_v40, 0.0 }
 0x9d3   :  { %1308 = vadd.xlane.f32.xlu1 %v1307_v41 }
 0x9e4   :  { %1324 = vrot.lane.b32.xlu1 %v1143_v62, %s1674_s8 }
 0x9e7   :  { %1319 = vrot.lane.b32.xlu0 %v1143_v62, %s1672_s5 }
 0xa5e   :  { %v1306_v42 = vpop.xlane.xlu0 %1305 }
 0xa5f   :  { %v1310_v43 = vmul.f32 0.03125, %v1306_v42 }
 0xa60   :  { %v1309_v44 = vpop.xlane.xlu1 %1308 }
 0xa61   :  { %v1312_v45 = vadd.f32 1e-05, %v1310_v43  ;;  %v1311_v46 = vmul.f32 0.03125, %v1309_v44 }
 0xa62   :  { %v1320_v3 = vpop.permute.xlu0 %1319 }
 0xa63   :  { %1640 = vrsqrt.f32 %v1312_v45  ;;  %v1313_v47 = vadd.f32 1e-05, %v1311_v46 }
 0xa64   :  { %v1325_v37 = vpop.permute.xlu1 %1324 }
 0xa65   :  { %1642 = vrsqrt.f32 %v1313_v47 }
 0xa6d   :  { %v1641_v32 = vpop.eup %1640 }
 0xa6e   :  { %v1316_v4 = vmul.f32 %v1641_v32, %v1300_v31 }
 0xa6f   :  { %v1643_v35 = vpop.eup %1642 }
 0xa70   :  { %v1317_v48 = vmul.f32 %v1643_v35, %v1301_v34  ;;  %v1322_v49 = vmul.f32 %v1320_v3, %v1316_v4 }
 0xa72   :  { %v1323_v50 = vmul.f32 %v1320_v3, %v1317_v48  ;;  %v1327_v51 = vadd.f32 %v1325_v37, %v1322_v49 }
 0xa74   :  { %v1328_v52 = vadd.f32 %v1325_v37, %v1323_v50  ;;  %1329 = vst.msk [vmem:[#allocation2] sm:$0xff] %vm49_vm1, %v1327_v51 }
 0xa76   :  { %1330 = vst.msk [vmem:[#allocation2 + $0x8] sm:$0xff] %vm49_vm1, %v1328_v52 }
 0xa77   :  { %1655 = shalt.err (!%p1652_p4)
}
 0xa78   :  { %s1656_s29 = scalar_lea.hbm %s2027_s6, 256 }
 0xa79   :  { %p1657_p5 = scmp.ne.s32.totalorder %s2027_s6, %s1656_s29  ;;  %p1660_p6 = scmp.lt.u32.totalorder %s1656_s29, %s2027_s6 }
 0xa7b   :  { %p1662_p7 = pnand %p1660_p6, %p1657_p5 }
 0xa7d   :  { %1665 = shalt.err (!%p1662_p7)
}
 0xa7e   :  { %s1680_s9 = smov 128  }
 0xa7f   :  { %1342 = dma.vmem_to_hbm [thread:$0]  %s1337_s27, 256, %s2027_s6, [#allocation3], %s1680_s9, %s1680_s9, %s1676_s13  }
 0xa80   :  { %1666 = dma.done.wait [#allocation3], 256  }
 0xa81   :  { %1667 = vsyncadd [#allocation3], 4294967040 }
 0xa82   :  { %1346 = vsyncpa [#allocation3], 1 }

</bundles_post_ra>
